<compile_context>
chip_gen: v6e
topology: v6e:2x2x1
jax: 0.10.0
libtpu: 0.0.40
codegen_flags: <defaults>
</compile_context>

<pallas_src>
import functools

import jax
import jax.numpy as jnp
from jax.experimental import pallas as pl
from jax.experimental.pallas import tpu as pltpu


# ----------------------------- Pallas kernel --------------------------------
def _lrgcn_rollout_kernel(num_relations, dim_emb,
                          x_ref, a_ref, h0_ref, c0_ref,
                          wx_ref, wh_ref, b_ref, wout_ref, bout_ref,
                          y_ref, hc_ref,
                          h_sc, c_sc):
    t = pl.program_id(0)
    d = dim_emb
    g = 4 * d                                   # fused gate width (= 128 lanes for D=32)

    # Initialize resident VMEM state on the first time step only.
    @pl.when(t == 0)
    def _():
        h_sc[...] = h0_ref[...]
        c_sc[...] = c0_ref[...]

    # Fused-gate pre-activations for root + all relations:
    #   res = X_t @ [Wx_root | Wx_rel_*]  +  H @ [Wh_root | Wh_rel_*]
    # Two bf16 MXU matmuls, f32 accumulation. H never leaves VMEM.
    h_bf = h_sc[...].astype(jnp.bfloat16)
    res = (jnp.dot(x_ref[0], wx_ref[...], preferred_element_type=jnp.float32)
           + jnp.dot(h_bf, wh_ref[...], preferred_element_type=jnp.float32))

    # Mean-normalized relational aggregation: root + sum_r A_r @ msg_r.
    # Per-relation matmuls on 128-lane tile-aligned slices (no scratch restack).
    gates = res[:, :g] + b_ref[...]
    for r in range(num_relations):
        msg_r = res[:, (r + 1) * g:(r + 2) * g].astype(jnp.bfloat16)
        gates = gates + jnp.dot(a_ref[0, r], msg_r,
                                preferred_element_type=jnp.float32)

    # Fused i | f | c~ | o gates (f32 elementwise; portable to v5e).
    i_g = jax.nn.sigmoid(gates[:, 0 * d:1 * d])      # input gate
    f_g = jax.nn.sigmoid(gates[:, 1 * d:2 * d])      # forget gate
    t_g = jnp.tanh(gates[:, 2 * d:3 * d])            # candidate cell
    o_g = jax.nn.sigmoid(gates[:, 3 * d:4 * d])      # output gate (uses old H, like LRGCN)

    c_new = f_g * c_sc[...] + i_g * t_g
    h_new = o_g * jnp.tanh(c_new)
    h_sc[...] = h_new
    c_sc[...] = c_new

    # Model-level readout: relu(h) -> Linear, lane-dense padded (128 output columns).
    h_relu = jnp.maximum(h_new, 0.0).astype(jnp.bfloat16)
    y_ref[0] = (jnp.dot(h_relu, wout_ref[...], preferred_element_type=jnp.float32)
                + bout_ref[...])

    # Final (h, c) state written out once, at the last time step.
    @pl.when(t == pl.num_programs(0) - 1)
    def _():
        hc_ref[0] = h_new
        hc_ref[1] = c_new


# ------------------------------ JAX wrappers ----------------------------------
def build_dense_adjacency(edge_index, edge_type, num_nodes, num_relations):
    """Densify (edge_index, edge_type) into mean-normalized A[r] of shape (R, N, N)."""
    src, dst = edge_index[0], edge_index[1]
    a = jnp.zeros((num_relations, num_nodes, num_nodes), jnp.float32)
    a = a.at[edge_type, dst, src].add(1.0)
    deg = a.sum(axis=-1, keepdims=True)
    return a / jnp.maximum(deg, 1.0)          # normalization in f32


def prepare_adjacency(edge_index, edge_type, num_nodes, num_relations):
    """Run ONCE per graph snapshot (NOT per forward step): densify, mean-normalize,
    pad nodes to a sublane multiple and cast to bf16. Returns (1, R, n_pad, n_pad);
    for a time-varying graph, stack T such snapshots along axis 0."""
    n_pad = max(8, -(-num_nodes // 8) * 8)
    a = build_dense_adjacency(edge_index, edge_type, num_nodes, num_relations)
    pad = n_pad - num_nodes
    if pad:
        a = jnp.pad(a, ((0, 0), (0, pad), (0, pad)))
    return a.astype(jnp.bfloat16)[None]


def prepare_weights(params):
    """Hoisted weight prep (run once per parameter update, NOT per forward):
    basis decomposition, gate/relation stacking, lane-dense readout padding, bf16 casts."""
    # basis decomposition: W_rel[g, r] = sum_b comp[g, r, b] * basis[g, b]
    wx_rel = jnp.einsum("grb,gbfd->grfd", params["comp_x"], params["basis_x"])  # (4,R,Fin,D)
    wh_rel = jnp.einsum("grb,gbfd->grfd", params["comp_h"], params["basis_h"])  # (4,R,D,D)

    four, fin, d = params["wx_root"].shape
    r = wx_rel.shape[1]
    g = 4 * d

    # Root transforms: gates stacked along output lanes -> (Fin, 4D) and (D, 4D).
    wx_root = jnp.transpose(params["wx_root"], (1, 0, 2)).reshape(fin, g)
    wh_root = jnp.transpose(params["wh_root"], (1, 0, 2)).reshape(d, g)
    # Relation transforms, relation-major columns -> (Fin, R*4D) and (D, R*4D).
    wx_relc = jnp.transpose(wx_rel, (2, 1, 0, 3)).reshape(fin, r * g)
    wh_relc = jnp.transpose(wh_rel, (2, 1, 0, 3)).reshape(d, r * g)

    wx_all = jnp.concatenate([wx_root, wx_relc], axis=1).astype(jnp.bfloat16)   # (Fin,(R+1)*4D)
    wh_all = jnp.concatenate([wh_root, wh_relc], axis=1).astype(jnp.bfloat16)   # (D,(R+1)*4D)
    bias = jnp.transpose(params["bx"] + params["bh"], (1, 0, 2)).reshape(1, g)

    # Lane-dense readout: pad dim_target up to 128 columns with zeros.
    d_out, t_out = params["w_out"].shape
    t_pad = max(128, -(-t_out // 128) * 128)
    w_out = jnp.zeros((d_out, t_pad), jnp.float32).at[:, :t_out].set(params["w_out"])
    b_out = jnp.zeros((1, t_pad), jnp.float32).at[:, :t_out].set(params["b_out"])

    return {
        "wx_all": wx_all,
        "wh_all": wh_all,
        "bias": bias.astype(jnp.float32),
        "w_out": w_out.astype(jnp.bfloat16),
        "b_out": b_out,
    }


def lrgcn_rollout(xs, a_all, prepped, prev_state=None, *, dim_target):
    """Multi-step rollout: xs is (T, N, Fin); a_all is (1 or T, R, n_pad, n_pad) bf16
    from prepare_adjacency. Returns (y of shape (T, N, dim_target), stacked (h, c))."""
    t_steps, n, fin = xs.shape
    d = prepped["wh_all"].shape[0]
    g = 4 * d
    r = prepped["wx_all"].shape[1] // g - 1
    t_pad = prepped["w_out"].shape[1]
    n_pad = max(8, -(-n // 8) * 8)
    pad = n_pad - n

    if prev_state is None:
        h0 = jnp.zeros((n_pad, d), jnp.float32)
        c0 = jnp.zeros((n_pad, d), jnp.float32)
    else:
        h0, c0 = prev_state
        h0 = jnp.pad(h0.astype(jnp.float32), ((0, n_pad - h0.shape[0]), (0, 0)))
        c0 = jnp.pad(c0.astype(jnp.float32), ((0, n_pad - c0.shape[0]), (0, 0)))

    if pad:
        xs = jnp.pad(xs, ((0, 0), (0, pad), (0, 0)))
    xs = xs.astype(jnp.bfloat16)

    # Static graph: constant index map (adjacency stays resident, DMA'd once).
    a_idx = (lambda t: (t, 0, 0, 0)) if a_all.shape[0] == t_steps else (lambda t: (0, 0, 0, 0))

    kernel = functools.partial(_lrgcn_rollout_kernel, r, d)

    y_pad, hc = pl.pallas_call(
        kernel,
        grid=(t_steps,),
        in_specs=[
            pl.BlockSpec((1, n_pad, fin), lambda t: (t, 0, 0)),          # x_t (streamed)
            pl.BlockSpec((1, r, n_pad, n_pad), a_idx),                   # adjacency
            pl.BlockSpec((n_pad, d), lambda t: (0, 0)),                  # h0
            pl.BlockSpec((n_pad, d), lambda t: (0, 0)),                  # c0
            pl.BlockSpec(prepped["wx_all"].shape, lambda t: (0, 0)),     # Wx (resident)
            pl.BlockSpec(prepped["wh_all"].shape, lambda t: (0, 0)),     # Wh (resident)
            pl.BlockSpec((1, g), lambda t: (0, 0)),                      # fused bias
            pl.BlockSpec(prepped["w_out"].shape, lambda t: (0, 0)),      # readout W
            pl.BlockSpec((1, t_pad), lambda t: (0, 0)),                  # readout b
        ],
        out_specs=(
            pl.BlockSpec((1, n_pad, t_pad), lambda t: (t, 0, 0)),        # y_t (lane-dense)
            pl.BlockSpec((2, n_pad, d), lambda t: (0, 0, 0)),            # final (h, c)
        ),
        out_shape=(
            jax.ShapeDtypeStruct((t_steps, n_pad, t_pad), jnp.float32),
            jax.ShapeDtypeStruct((2, n_pad, d), jnp.float32),
        ),
        scratch_shapes=[pltpu.VMEM((n_pad, d), jnp.float32),             # resident h
                        pltpu.VMEM((n_pad, d), jnp.float32)],            # resident c
        compiler_params=pltpu.CompilerParams(
            dimension_semantics=("arbitrary",)),                          # sequential h/c carry
    )(xs, a_all, h0, c0,
      prepped["wx_all"], prepped["wh_all"], prepped["bias"],
      prepped["w_out"], prepped["b_out"])

    return y_pad[:, :n, :dim_target], hc[:, :n, :]


def lrgcn_model_forward(x, a_norm, prepped, prev_state=None, *, dim_target):
    """Single-snapshot forward matching LRGCNModel.forward: returns (out, stack((h, c)))."""
    y, hc = lrgcn_rollout(x[None], a_norm, prepped, prev_state, dim_target=dim_target)
    return y[0], hc


def init_params(key, dim_node_features, dim_embedding, dim_target,
                num_relations, num_bases):
    ks = jax.random.split(key, 10)
    s = 0.1
    fin, d = dim_node_features, dim_embedding
    return {
        # x-side RGCNConvs for the 4 gates (i, f, c, o)
        "wx_root": s * jax.random.normal(ks[0], (4, fin, d), jnp.float32),
        "basis_x": s * jax.random.normal(ks[1], (4, num_bases, fin, d), jnp.float32),
        "comp_x":  s * jax.random.normal(ks[2], (4, num_relations, num_bases), jnp.float32),
        "bx":      s * jax.random.normal(ks[3], (4, 1, d), jnp.float32),
        # h-side RGCNConvs for the 4 gates
        "wh_root": s * jax.random.normal(ks[4], (4, d, d), jnp.float32),
        "basis_h": s * jax.random.normal(ks[5], (4, num_bases, d, d), jnp.float32),
        "comp_h":  s * jax.random.normal(ks[6], (4, num_relations, num_bases), jnp.float32),
        "bh":      s * jax.random.normal(ks[7], (4, 1, d), jnp.float32),
        # linear readout (predictor)
        "w_out":   s * jax.random.normal(ks[8], (d, dim_target), jnp.float32),
        "b_out":   s * jax.random.normal(ks[9], (1, dim_target), jnp.float32),
    }


if __name__ == "__main__":
    T_STEPS = 8
    N_NODES = 16
    DIM_NODE_FEATURES = 8
    DIM_EMBEDDING = 32       # config['out_channels']
    DIM_TARGET = 4
    NUM_RELATIONS = 3        # config['num_relations']
    NUM_BASES = 2            # config['num_bases']
    N_EDGES = 48

    key = jax.random.PRNGKey(0)
    k_x, k_ei, k_et, k_p = jax.random.split(key, 4)

    xs = jax.random.normal(k_x, (T_STEPS, N_NODES, DIM_NODE_FEATURES), jnp.float32)
    edge_index = jax.random.randint(k_ei, (2, N_EDGES), 0, N_NODES, jnp.int32)
    edge_type = jax.random.randint(k_et, (N_EDGES,), 0, NUM_RELATIONS, jnp.int32)

    params = init_params(k_p, DIM_NODE_FEATURES, DIM_EMBEDDING, DIM_TARGET,
                         NUM_RELATIONS, NUM_BASES)
    prepped = prepare_weights(params)                                 # once per param update
    a_norm = prepare_adjacency(edge_index, edge_type, N_NODES, NUM_RELATIONS)  # once per graph

    # Multi-step rollout: one pallas_call, grid=(T,), resident h/c state.
    rollout = jax.jit(lambda xs_, a_, pp: lrgcn_rollout(xs_, a_, pp, None,
                                                        dim_target=DIM_TARGET))
    ys, state = rollout(xs, a_norm, prepped)
    jax.block_until_ready((ys, state))

    # Single-snapshot forward with the module's original (out, stack((h, c))) contract.
    single = jax.jit(lambda x_, a_, pp: lrgcn_model_forward(x_, a_, pp, None,
                                                            dim_target=DIM_TARGET))
    out1, state1 = single(xs[0], a_norm, prepped)
    jax.block_until_ready((out1, state1))

    assert ys.shape == (T_STEPS, N_NODES, DIM_TARGET)
    assert state.shape == (2, N_NODES, DIM_EMBEDDING)
    assert out1.shape == (N_NODES, DIM_TARGET)
    assert state1.shape == (2, N_NODES, DIM_EMBEDDING)
    assert bool(jnp.all(jnp.isfinite(ys))) and bool(jnp.all(jnp.isfinite(state)))
    assert bool(jnp.all(jnp.isfinite(out1))) and bool(jnp.all(jnp.isfinite(state1)))
    print("KERNEL_OK")
</pallas_src>

<mosaic_0001>
module attributes {stable_mosaic.version = 11 : i64} {
  func.func @_lrgcn_rollout_kernel(%arg0: i32, %arg1: memref<1x16x8xbf16, #tpu.memory_space<vmem>>, %arg2: memref<1x3x16x16xbf16, #tpu.memory_space<vmem>>, %arg3: memref<16x32xf32, #tpu.memory_space<vmem>>, %arg4: memref<16x32xf32, #tpu.memory_space<vmem>>, %arg5: memref<8x512xbf16, #tpu.memory_space<vmem>>, %arg6: memref<32x512xbf16, #tpu.memory_space<vmem>>, %arg7: memref<1x128xf32, #tpu.memory_space<vmem>>, %arg8: memref<32x128xbf16, #tpu.memory_space<vmem>>, %arg9: memref<1x128xf32, #tpu.memory_space<vmem>>, %arg10: memref<1x16x128xf32, #tpu.memory_space<vmem>>, %arg11: memref<2x16x32xf32, #tpu.memory_space<vmem>>, %arg12: memref<16x32xf32, #tpu.memory_space<vmem>>, %arg13: memref<16x32xf32, #tpu.memory_space<vmem>>) attributes {dimension_semantics = [#tpu.dimension_semantics<arbitrary>], iteration_bounds = array<i64: 8>, scalar_prefetch = 0 : i64, scratch_operands = 2 : i64, tpu.core_type = #tpu.core_type<tc>, window_params = [{transform_indices = @transform_0, window_bounds = array<i64: 1, 16, 8>}, {pipeline_mode = #tpu.pipeline_mode<synchronous>, transform_indices = @transform_1, window_bounds = array<i64: 1, 3, 16, 16>}, {pipeline_mode = #tpu.pipeline_mode<synchronous>, transform_indices = @transform_2, window_bounds = array<i64: 16, 32>}, {pipeline_mode = #tpu.pipeline_mode<synchronous>, transform_indices = @transform_3, window_bounds = array<i64: 16, 32>}, {pipeline_mode = #tpu.pipeline_mode<synchronous>, transform_indices = @transform_4, window_bounds = array<i64: 8, 512>}, {pipeline_mode = #tpu.pipeline_mode<synchronous>, transform_indices = @transform_5, window_bounds = array<i64: 32, 512>}, {pipeline_mode = #tpu.pipeline_mode<synchronous>, transform_indices = @transform_6, window_bounds = array<i64: 1, 128>}, {pipeline_mode = #tpu.pipeline_mode<synchronous>, transform_indices = @transform_7, window_bounds = array<i64: 32, 128>}, {pipeline_mode = #tpu.pipeline_mode<synchronous>, transform_indices = @transform_8, window_bounds = array<i64: 1, 128>}, {transform_indices = @transform_9, window_bounds = array<i64: 1, 16, 128>}, {pipeline_mode = #tpu.pipeline_mode<synchronous>, transform_indices = @transform_10, window_bounds = array<i64: 2, 16, 32>}]} {
    %c0_i32 = arith.constant 0 : i32
    %0 = arith.cmpi eq, %arg0, %c0_i32 : i32
    %1 = arith.extui %0 : i1 to i32
    %c0_i32_0 = arith.constant 0 : i32
    %2 = arith.cmpi ne, %1, %c0_i32_0 : i32
    scf.if %2 {
      %c0_44 = arith.constant 0 : index
      %c0_45 = arith.constant 0 : index
      %76 = vector.load %arg3[%c0_44, %c0_45] : memref<16x32xf32, #tpu.memory_space<vmem>>, vector<16x32xf32>
      %c0_46 = arith.constant 0 : index
      %c0_47 = arith.constant 0 : index
      %77 = vector.load %arg12[%c0_46, %c0_47] : memref<16x32xf32, #tpu.memory_space<vmem>>, vector<16x32xf32>
      tpu.vector_store %arg12[%c0_46, %c0_47], %76 {strides = array<i32>} : memref<16x32xf32, #tpu.memory_space<vmem>>, vector<16x32xf32>,
      %c0_48 = arith.constant 0 : index
      %c0_49 = arith.constant 0 : index
      %78 = vector.load %arg4[%c0_48, %c0_49] : memref<16x32xf32, #tpu.memory_space<vmem>>, vector<16x32xf32>
      %c0_50 = arith.constant 0 : index
      %c0_51 = arith.constant 0 : index
      %79 = vector.load %arg13[%c0_50, %c0_51] : memref<16x32xf32, #tpu.memory_space<vmem>>, vector<16x32xf32>
      tpu.vector_store %arg13[%c0_50, %c0_51], %78 {strides = array<i32>} : memref<16x32xf32, #tpu.memory_space<vmem>>, vector<16x32xf32>,
    } else {
    }
    %c0 = arith.constant 0 : index
    %c0_1 = arith.constant 0 : index
    %3 = vector.load %arg12[%c0, %c0_1] : memref<16x32xf32, #tpu.memory_space<vmem>>, vector<16x32xf32>
    %4 = arith.truncf %3 : vector<16x32xf32> to vector<16x32xbf16>
    %c0_2 = arith.constant 0 : index
    %c0_3 = arith.constant 0 : index
    %c0_4 = arith.constant 0 : index
    %5 = vector.load %arg1[%c0_2, %c0_3, %c0_4] : memref<1x16x8xbf16, #tpu.memory_space<vmem>>, vector<1x16x8xbf16>
    %6 = vector.shape_cast %5 : vector<1x16x8xbf16> to vector<16x8xbf16>
    %c0_5 = arith.constant 0 : index
    %c0_6 = arith.constant 0 : index
    %7 = vector.load %arg5[%c0_5, %c0_6] : memref<8x512xbf16, #tpu.memory_space<vmem>>, vector<8x512xbf16>
    %cst = arith.constant dense<0.000000e+00> : vector<16x512xf32>
    %8 = tpu.matmul %6, %7, %cst {dimension_numbers = #tpu.dot_dimension_numbers<[1], [0], [0], [1], [0, 0, 1, 1], [], []>} : vector<16x8xbf16>, vector<8x512xbf16>, vector<16x512xf32> -> vector<16x512xf32>
    %c0_7 = arith.constant 0 : index
    %c0_8 = arith.constant 0 : index
    %9 = vector.load %arg6[%c0_7, %c0_8] : memref<32x512xbf16, #tpu.memory_space<vmem>>, vector<32x512xbf16>
    %cst_9 = arith.constant dense<0.000000e+00> : vector<16x512xf32>
    %10 = tpu.matmul %4, %9, %cst_9 {dimension_numbers = #tpu.dot_dimension_numbers<[1], [0], [0], [1], [0, 0, 1, 1], [], []>} : vector<16x32xbf16>, vector<32x512xbf16>, vector<16x512xf32> -> vector<16x512xf32>
    %11 = arith.addf %8, %10 : vector<16x512xf32>
    %12 = vector.extract_strided_slice %11 {offsets = [0, 0], sizes = [16, 128], strides = [1, 1]} : vector<16x512xf32> to vector<16x128xf32>
    %c0_10 = arith.constant 0 : index
    %c0_11 = arith.constant 0 : index
    %13 = vector.load %arg7[%c0_10, %c0_11] : memref<1x128xf32, #tpu.memory_space<vmem>>, vector<1x128xf32>
    %14 = vector.broadcast %13 : vector<1x128xf32> to vector<16x128xf32>
    %15 = arith.addf %12, %14 : vector<16x128xf32>
    %16 = vector.extract_strided_slice %11 {offsets = [0, 128], sizes = [16, 128], strides = [1, 1]} : vector<16x512xf32> to vector<16x128xf32>
    %17 = arith.truncf %16 : vector<16x128xf32> to vector<16x128xbf16>
    %c0_12 = arith.constant 0 : index
    %c0_13 = arith.constant 0 : index
    %c0_14 = arith.constant 0 : index
    %c0_15 = arith.constant 0 : index
    %18 = vector.load %arg2[%c0_12, %c0_13, %c0_14, %c0_15] : memref<1x3x16x16xbf16, #tpu.memory_space<vmem>>, vector<1x1x16x16xbf16>
    %19 = vector.shape_cast %18 : vector<1x1x16x16xbf16> to vector<16x16xbf16>
    %cst_16 = arith.constant dense<0.000000e+00> : vector<16x128xf32>
    %20 = tpu.matmul %19, %17, %cst_16 {dimension_numbers = #tpu.dot_dimension_numbers<[1], [0], [0], [1], [0, 0, 1, 1], [], []>} : vector<16x16xbf16>, vector<16x128xbf16>, vector<16x128xf32> -> vector<16x128xf32>
    %21 = arith.addf %15, %20 : vector<16x128xf32>
    %22 = vector.extract_strided_slice %11 {offsets = [0, 256], sizes = [16, 128], strides = [1, 1]} : vector<16x512xf32> to vector<16x128xf32>
    %23 = arith.truncf %22 : vector<16x128xf32> to vector<16x128xbf16>
    %c0_17 = arith.constant 0 : index
    %c1 = arith.constant 1 : index
    %c0_18 = arith.constant 0 : index
    %c0_19 = arith.constant 0 : index
    %24 = vector.load %arg2[%c0_17, %c1, %c0_18, %c0_19] : memref<1x3x16x16xbf16, #tpu.memory_space<vmem>>, vector<1x1x16x16xbf16>
    %25 = vector.shape_cast %24 : vector<1x1x16x16xbf16> to vector<16x16xbf16>
    %cst_20 = arith.constant dense<0.000000e+00> : vector<16x128xf32>
    %26 = tpu.matmul %25, %23, %cst_20 {dimension_numbers = #tpu.dot_dimension_numbers<[1], [0], [0], [1], [0, 0, 1, 1], [], []>} : vector<16x16xbf16>, vector<16x128xbf16>, vector<16x128xf32> -> vector<16x128xf32>
    %27 = arith.addf %21, %26 : vector<16x128xf32>
    %28 = vector.extract_strided_slice %11 {offsets = [0, 384], sizes = [16, 128], strides = [1, 1]} : vector<16x512xf32> to vector<16x128xf32>
    %29 = arith.truncf %28 : vector<16x128xf32> to vector<16x128xbf16>
    %c0_21 = arith.constant 0 : index
    %c2 = arith.constant 2 : index
    %c0_22 = arith.constant 0 : index
    %c0_23 = arith.constant 0 : index
    %30 = vector.load %arg2[%c0_21, %c2, %c0_22, %c0_23] : memref<1x3x16x16xbf16, #tpu.memory_space<vmem>>, vector<1x1x16x16xbf16>
    %31 = vector.shape_cast %30 : vector<1x1x16x16xbf16> to vector<16x16xbf16>
    %cst_24 = arith.constant dense<0.000000e+00> : vector<16x128xf32>
    %32 = tpu.matmul %31, %29, %cst_24 {dimension_numbers = #tpu.dot_dimension_numbers<[1], [0], [0], [1], [0, 0, 1, 1], [], []>} : vector<16x16xbf16>, vector<16x128xbf16>, vector<16x128xf32> -> vector<16x128xf32>
    %33 = arith.addf %27, %32 : vector<16x128xf32>
    %34 = vector.extract_strided_slice %33 {offsets = [0, 0], sizes = [16, 32], strides = [1, 1]} : vector<16x128xf32> to vector<16x32xf32>
    %35 = arith.negf %34 : vector<16x32xf32>
    %36 = math.exp %35 : vector<16x32xf32>
    %cst_25 = arith.constant 1.000000e+00 : f32
    %37 = vector.broadcast %cst_25 : f32 to vector<16x32xf32>
    %38 = arith.addf %37, %36 : vector<16x32xf32>
    %39 = arith.divf %37, %38 : vector<16x32xf32>
    %40 = vector.extract_strided_slice %33 {offsets = [0, 32], sizes = [16, 32], strides = [1, 1]} : vector<16x128xf32> to vector<16x32xf32>
    %41 = arith.negf %40 : vector<16x32xf32>
    %42 = math.exp %41 : vector<16x32xf32>
    %cst_26 = arith.constant 1.000000e+00 : f32
    %43 = vector.broadcast %cst_26 : f32 to vector<16x32xf32>
    %44 = arith.addf %43, %42 : vector<16x32xf32>
    %45 = arith.divf %43, %44 : vector<16x32xf32>
    %46 = vector.extract_strided_slice %33 {offsets = [0, 64], sizes = [16, 32], strides = [1, 1]} : vector<16x128xf32> to vector<16x32xf32>
    %47 = math.tanh %46 : vector<16x32xf32>
    %48 = vector.extract_strided_slice %33 {offsets = [0, 96], sizes = [16, 32], strides = [1, 1]} : vector<16x128xf32> to vector<16x32xf32>
    %49 = arith.negf %48 : vector<16x32xf32>
    %50 = math.exp %49 : vector<16x32xf32>
    %cst_27 = arith.constant 1.000000e+00 : f32
    %51 = vector.broadcast %cst_27 : f32 to vector<16x32xf32>
    %52 = arith.addf %51, %50 : vector<16x32xf32>
    %53 = arith.divf %51, %52 : vector<16x32xf32>
    %c0_28 = arith.constant 0 : index
    %c0_29 = arith.constant 0 : index
    %54 = vector.load %arg13[%c0_28, %c0_29] : memref<16x32xf32, #tpu.memory_space<vmem>>, vector<16x32xf32>
    %55 = arith.mulf %45, %54 : vector<16x32xf32>
    %56 = arith.mulf %39, %47 : vector<16x32xf32>
    %57 = arith.addf %55, %56 : vector<16x32xf32>
    %58 = math.tanh %57 : vector<16x32xf32>
    %59 = arith.mulf %53, %58 : vector<16x32xf32>
    %c0_30 = arith.constant 0 : index
    %c0_31 = arith.constant 0 : index
    %60 = vector.load %arg12[%c0_30, %c0_31] : memref<16x32xf32, #tpu.memory_space<vmem>>, vector<16x32xf32>
    tpu.vector_store %arg12[%c0_30, %c0_31], %59 {strides = array<i32>} : memref<16x32xf32, #tpu.memory_space<vmem>>, vector<16x32xf32>,
    %c0_32 = arith.constant 0 : index
    %c0_33 = arith.constant 0 : index
    %61 = vector.load %arg13[%c0_32, %c0_33] : memref<16x32xf32, #tpu.memory_space<vmem>>, vector<16x32xf32>
    tpu.vector_store %arg13[%c0_32, %c0_33], %57 {strides = array<i32>} : memref<16x32xf32, #tpu.memory_space<vmem>>, vector<16x32xf32>,
    %cst_34 = arith.constant 0.000000e+00 : f32
    %62 = vector.broadcast %cst_34 : f32 to vector<16x32xf32>
    %63 = arith.maximumf %59, %62 : vector<16x32xf32>
    %64 = arith.truncf %63 : vector<16x32xf32> to vector<16x32xbf16>
    %c0_35 = arith.constant 0 : index
    %c0_36 = arith.constant 0 : index
    %65 = vector.load %arg8[%c0_35, %c0_36] : memref<32x128xbf16, #tpu.memory_space<vmem>>, vector<32x128xbf16>
    %cst_37 = arith.constant dense<0.000000e+00> : vector<16x128xf32>
    %66 = tpu.matmul %64, %65, %cst_37 {dimension_numbers = #tpu.dot_dimension_numbers<[1], [0], [0], [1], [0, 0, 1, 1], [], []>} : vector<16x32xbf16>, vector<32x128xbf16>, vector<16x128xf32> -> vector<16x128xf32>
    %c0_38 = arith.constant 0 : index
    %c0_39 = arith.constant 0 : index
    %67 = vector.load %arg9[%c0_38, %c0_39] : memref<1x128xf32, #tpu.memory_space<vmem>>, vector<1x128xf32>
    %68 = vector.broadcast %67 : vector<1x128xf32> to vector<16x128xf32>
    %69 = arith.addf %66, %68 : vector<16x128xf32>
    %c0_40 = arith.constant 0 : index
    %c0_41 = arith.constant 0 : index
    %c0_42 = arith.constant 0 : index
    %70 = vector.load %arg10[%c0_40, %c0_41, %c0_42] : memref<1x16x128xf32, #tpu.memory_space<vmem>>, vector<1x16x128xf32>
    %71 = vector.shape_cast %70 : vector<1x16x128xf32> to vector<16x128xf32>
    %72 = vector.shape_cast %69 : vector<16x128xf32> to vector<1x16x128xf32>
    tpu.vector_store %arg10[%c0_40, %c0_41, %c0_42], %72 {strides = array<i32>} : memref<1x16x128xf32, #tpu.memory_space<vmem>>, vector<1x16x128xf32>,
    %c7_i32 = arith.constant 7 : i32
    %73 = arith.cmpi eq, %arg0, %c7_i32 : i32
    %74 = arith.extui %73 : i1 to i32
    %c0_i32_43 = arith.constant 0 : i32
    %75 = arith.cmpi ne, %74, %c0_i32_43 : i32
    scf.if %75 {
      %c0_44 = arith.constant 0 : index
      %c0_45 = arith.constant 0 : index
      %c0_46 = arith.constant 0 : index
      %76 = vector.load %arg11[%c0_44, %c0_45, %c0_46] : memref<2x16x32xf32, #tpu.memory_space<vmem>>, vector<1x16x32xf32>
      %77 = vector.shape_cast %76 : vector<1x16x32xf32> to vector<16x32xf32>
      %78 = vector.shape_cast %59 : vector<16x32xf32> to vector<1x16x32xf32>
      tpu.vector_store %arg11[%c0_44, %c0_45, %c0_46], %78 {strides = array<i32>} : memref<2x16x32xf32, #tpu.memory_space<vmem>>, vector<1x16x32xf32>,
      %c1_47 = arith.constant 1 : index
      %c0_48 = arith.constant 0 : index
      %c0_49 = arith.constant 0 : index
      %79 = vector.load %arg11[%c1_47, %c0_48, %c0_49] : memref<2x16x32xf32, #tpu.memory_space<vmem>>, vector<1x16x32xf32>
      %80 = vector.shape_cast %79 : vector<1x16x32xf32> to vector<16x32xf32>
      %81 = vector.shape_cast %57 : vector<16x32xf32> to vector<1x16x32xf32>
      tpu.vector_store %arg11[%c1_47, %c0_48, %c0_49], %81 {strides = array<i32>} : memref<2x16x32xf32, #tpu.memory_space<vmem>>, vector<1x16x32xf32>,
    } else {
    }
    return
  }
  func.func @transform_0(%arg0: i32) -> (i32, i32, i32) {
    %c0_i32 = arith.constant 0 : i32
    %c0_i32_0 = arith.constant 0 : i32
    %c0_i32_1 = arith.constant 0 : i32
    return %arg0, %c0_i32, %c0_i32_0 : i32, i32, i32
  }
  func.func @transform_1(%arg0: i32) -> (i32, i32, i32, i32) {
    %c0_i32 = arith.constant 0 : i32
    %c0_i32_0 = arith.constant 0 : i32
    %c0_i32_1 = arith.constant 0 : i32
    %c0_i32_2 = arith.constant 0 : i32
    %c0_i32_3 = arith.constant 0 : i32
    return %c0_i32, %c0_i32_0, %c0_i32_1, %c0_i32_2 : i32, i32, i32, i32
  }
  func.func @transform_2(%arg0: i32) -> (i32, i32) {
    %c0_i32 = arith.constant 0 : i32
    %c0_i32_0 = arith.constant 0 : i32
    %c0_i32_1 = arith.constant 0 : i32
    return %c0_i32, %c0_i32_0 : i32, i32
  }
  func.func @transform_3(%arg0: i32) -> (i32, i32) {
    %c0_i32 = arith.constant 0 : i32
    %c0_i32_0 = arith.constant 0 : i32
    %c0_i32_1 = arith.constant 0 : i32
    return %c0_i32, %c0_i32_0 : i32, i32
  }
  func.func @transform_4(%arg0: i32) -> (i32, i32) {
    %c0_i32 = arith.constant 0 : i32
    %c0_i32_0 = arith.constant 0 : i32
    %c0_i32_1 = arith.constant 0 : i32
    return %c0_i32, %c0_i32_0 : i32, i32
  }
  func.func @transform_5(%arg0: i32) -> (i32, i32) {
    %c0_i32 = arith.constant 0 : i32
    %c0_i32_0 = arith.constant 0 : i32
    %c0_i32_1 = arith.constant 0 : i32
    return %c0_i32, %c0_i32_0 : i32, i32
  }
  func.func @transform_6(%arg0: i32) -> (i32, i32) {
    %c0_i32 = arith.constant 0 : i32
    %c0_i32_0 = arith.constant 0 : i32
    %c0_i32_1 = arith.constant 0 : i32
    return %c0_i32, %c0_i32_0 : i32, i32
  }
  func.func @transform_7(%arg0: i32) -> (i32, i32) {
    %c0_i32 = arith.constant 0 : i32
    %c0_i32_0 = arith.constant 0 : i32
    %c0_i32_1 = arith.constant 0 : i32
    return %c0_i32, %c0_i32_0 : i32, i32
  }
  func.func @transform_8(%arg0: i32) -> (i32, i32) {
    %c0_i32 = arith.constant 0 : i32
    %c0_i32_0 = arith.constant 0 : i32
    %c0_i32_1 = arith.constant 0 : i32
    return %c0_i32, %c0_i32_0 : i32, i32
  }
  func.func @transform_9(%arg0: i32) -> (i32, i32, i32) {
    %c0_i32 = arith.constant 0 : i32
    %c0_i32_0 = arith.constant 0 : i32
    %c0_i32_1 = arith.constant 0 : i32
    return %arg0, %c0_i32, %c0_i32_0 : i32, i32, i32
  }
  func.func @transform_10(%arg0: i32) -> (i32, i32, i32) {
    %c0_i32 = arith.constant 0 : i32
    %c0_i32_0 = arith.constant 0 : i32
    %c0_i32_1 = arith.constant 0 : i32
    %c0_i32_2 = arith.constant 0 : i32
    return %c0_i32, %c0_i32_0, %c0_i32_1 : i32, i32, i32
  }
}

</mosaic_0001>

<bundles_post_ra>
// kernel: _lambda_.1
= control target key start
LH: loop header
LB: loop body
LE: loop exit
PB: predicated region body
PF: predicated region fallthrough
CT: control target
= control target key end

     0   :  { %16 = vsyncpa [#allocation5], 0  ;;  %s1302_s13 = smov 0   ;;  %s1442_s0 = inlined_call_operand.vmem [shape: bf16[8,16,8], index: 0, kind: input, shape index: {}]   ;;  %s1443_s1 = inlined_call_operand.vmem [shape: bf16[1,3,16,16], index: 1, kind: input, shape index: {}]   ;;  %s1444_s2 = inlined_call_operand.vmem [shape: f32[16,32], index: 2, kind: input, shape index: {}, may-alias: {2,3}]   ;;  %s1445_s3 = inlined_call_operand.vmem [shape: f32[16,32], index: 3, kind: input, shape index: {}, may-alias: {2,3}]   ;;  %s1446_s4 = inlined_call_operand.vmem [shape: bf16[8,512], index: 4, kind: input, shape index: {}]   ;;  %s1447_s5 = inlined_call_operand.vmem [shape: bf16[32,512], index: 5, kind: input, shape index: {}]   ;;  %s1448_s6 = inlined_call_operand.vmem [shape: f32[1,128], index: 6, kind: input, shape index: {}]   ;;  %s1449_s7 = inlined_call_operand.vmem [shape: bf16[32,128], index: 7, kind: input, shape index: {}]   ;;  %s1450_s8 = inlined_call_operand.vmem [shape: f32[1,128], index: 8, kind: input, shape index: {}]   ;;  %s1451_s9 = inlined_call_operand.vmem [shape: f32[8,16,128], index: 9, kind: output, shape index: {0}]   ;;  %s1452_s10 = inlined_call_operand.hbm [shape: f32[2,16,32], index: 10, kind: output, shape index: {1}]  }
   0x1 LB: > { %s1308_s14 = sadd.s32 4294967295, %s1236_s13   ;;  %p1057_p0 = scmp.ge.s32.totalorder %s1236_s13, 1  ;;  %s1236_s13 = sphi %s1302_s13, %s22_s13  }
   0x2   : > { %p311_p1 = scmp.lt.s32.totalorder %s1236_s13, 9 }
   0x4   : > { %p312_p2 = pnand %p1057_p0, %p311_p1 }
   0x5   : > { %p349_p3 = scmp.lt.s32.totalorder (!%p312_p2), %s1308_s14, 7  ;;  %p1062_p4 = scmp.ne.s32.totalorder (!%p312_p2), %s1308_s14, 0 }
   0x6   : > { %315 = sbr.rel (%p312_p2) target bundleno = 1167 (0x48f), region = 56 }
   0xb   : > { %s350_s15 = scalar_select %p349_p3, %s1308_s14, 7 }
   0xc   : > { %363 = sbr.rel (%p1062_p4) target bundleno = 20 (0x14), region = 60 }
   0xd   : > { %s1104_s16 = sshll.u32 %s350_s15, 3  ;;  %s1105_s17 = sshll.u32 %s350_s15, 4 }
   0xe   : > { %s1317_s20 = scalar_lea.vmem %s1442_s0, %s1104_s16  ;;  %s1322_s23 = scalar_lea.vmem %s1451_s9, %s1105_s17 }
  0x11   : > { %v364_v0 = vld [vmem:[%s1444_s2] sm:$0xff]  ;;  %vm366_vm0 = vcmask 261120   ;;  %v365_v1 = vld [vmem:[%s1444_s2 + $0x8] sm:$0xff] }
  0x12   : > { %v369_v2 = vld [vmem:[%s1445_s3] sm:$0xff]  ;;  %367 = vst.msk [vmem:[#allocation2] sm:$0xff] %vm366_vm0, %v364_v0  ;;  %368 = vst.msk [vmem:[#allocation2 + $0x8] sm:$0xff] %vm366_vm0, %v365_v1  ;;  %v370_v3 = vld [vmem:[%s1445_s3 + $0x8] sm:$0xff] }
  0x13   : > { %371 = vst.msk [vmem:[#allocation3] sm:$0xff] %vm366_vm0, %v369_v2  ;;  %372 = vst.msk [vmem:[#allocation3 + $0x8] sm:$0xff] %vm366_vm0, %v370_v3 }
  0x14 PF: > { %v1164_v4 = vld [vmem:[%s1447_s5 + $0x24] ss:$16 sps:$4 sm:$0xff]   ;;  %v1166_v5 = vld [vmem:[%s1447_s5 + $0x2c] ss:$16 sps:$4 sm:$0xff]   ;;  %v1238_v6 = vmov 0   ;;  %vm428_vm1 = vcmask 261120  }
  0x15   : > { %464 = vmatprep.mubr.bf16.mxu0 %v1238_v6  ;;  %507 = vmatprep.mubr.bf16.mxu1 %v1238_v6  ;;  %v1168_v7 = vld [vmem:[%s1447_s5 + $0x20] ss:$16 sps:$4 sm:$0xff]   ;;  %v1169_v8 = vld [vmem:[%s1447_s5 + $0x28] ss:$16 sps:$4 sm:$0xff]   ;;  %v1170_v9 = vld [vmem:[%s1447_s5 + $0x4] ss:$16 sps:$4 sm:$0xff]  }
  0x16   : > { %444 = vmatprep.subr.bf16.mxu0 %v1164_v4  ;;  %487 = vmatprep.subr.bf16.mxu1 %v1166_v5  ;;  %v1172_v10 = vld [vmem:[%s1447_s5 + $0xc] ss:$16 sps:$4 sm:$0xff]   ;;  %v1174_v11 = vld [vmem:[%s1447_s5] ss:$16 sps:$4 sm:$0xff]   ;;  %v1175_v12 = vld [vmem:[%s1447_s5 + $0x8] ss:$16 sps:$4 sm:$0xff]  }
  0x17   : > { %445 = vmatpush1.bf16.msra.mxu0 %v1168_v7  ;;  %488 = vmatpush1.bf16.msra.mxu1 %v1169_v8  ;;  %v378_v16 = vld [vmem:[%s1446_s4] sm:$0xff]  ;;  %vm537_vm2 = vcmask 1043456   ;;  %v379_v17 = vld [vmem:[%s1446_s4 + $0x8] sm:$0xff]  ;;  %vm533_vm3 = vcmask 64512   ;;  %v1239_v25 = vmov 0.0   ;;  %vm1240_vm4 = vmmov 0  }
  0x18   : > { %446 = vmatprep.subr.bf16.mxu0 %v1170_v9  ;;  %489 = vmatprep.subr.bf16.mxu1 %v1172_v10  ;;  %v1075_v18 = vcombine.high %v378_v16, %v378_v16  ;;  %v1077_v19 = vcombine.high %v379_v17, %v379_v17  ;;  %v1074_v20 = vcombine.low %v378_v16, %v378_v16  ;;  %v1180_v24 = vld [vmem:[%s1317_s20] sm:$0xff]   ;;  %s1241_s18 = smov 32   ;;  %v1182_v51 = vld [vmem:[%s1443_s1 + $0x8] sm:$0xff]   ;;  %vm653_vm5 = vcmask 130048   ;;  %v1183_v57 = vld [vmem:[%s1443_s1 + $0x10] sm:$0xff]   ;;  %s1242_s28 = smov 64  }
  0x19   : > { %v373_v13 = vld [vmem:[#allocation2] sm:$0xff]  ;;  %v374_v14 = vld [vmem:[#allocation2 + $0x8] sm:$0xff]  ;;  %v1076_v21 = vcombine.low %v379_v17, %v379_v17  ;;  %s1243_s15 = smov 96   ;;  %p1099_p5 = scmp.ne.s32.totalorder %s1308_s14, 7 }
  0x1a   : > { %v375_v15 = vpack.c.bf16 %v374_v14, %v373_v13  ;;  %v539_v22 = vsel %vm537_vm2, %v1074_v20, 0  ;;  %v824_v26 = vld [vmem:[#allocation3] sm:$0xff]  ;;  %v825_v27 = vld [vmem:[#allocation3 + $0x8] sm:$0xff]  ;;  %v1181_v54 = vld [vmem:[%s1443_s1] sm:$0xff]  }
  0x1b   : > { %447 = vmatpush1.bf16.msra.mxu0 %v1174_v11  ;;  %490 = vmatpush1.bf16.msra.mxu1 %v1175_v12  ;;  %v545_v23 = vsel %vm537_vm2, %v1076_v21, 0  ;;  %v1082_v58 = vld [vmem:[%s1448_s6] ss:$0 sm:$0xff] }
  0x1c   : > { %1078 = vmatprep.subr.msk.bf16.mxu0 %vm537_vm2, %v1075_v18  ;;  %1080 = vmatprep.subr.msk.bf16.mxu1 %vm537_vm2, %v1077_v19 }
  0x1d   : > { %828 = vrot.lane.b32.xlu1 %v824_v26, %s1241_s18 }
  0x1e   : > { %1071 = vmatmul.mubr.msk.bf16.vlgmr.msra.gmra.mxu0 %vm428_vm1, %v375_v15  ;;  %1072 = vmatmul.mubr.msk.bf16.vlgmr.msra.gmra.mxu1 %vm428_vm1, %v375_v15 }
  0x1f   : > { %565 = vmatpush1.bf16.msra.mxu0 %v539_v22  ;;  %608 = vmatpush1.bf16.msra.mxu1 %v545_v23 }
  0x20   : > { %582 = vmatprep.mubr.bf16.mxu0 %v1238_v6  ;;  %625 = vmatprep.mubr.bf16.mxu1 %v1238_v6 }
  0x21   : > { %1121 = vmatprep.subr.bf16.mxu1 %v1239_v25  ;;  %1115 = vmatprep.subr.bf16.mxu0 %v1239_v25 }
  0x22   : > { %830 = vrot.lane.b32.xlu1 %v825_v27, %s1241_s18 }
  0x26   : > { %1079 = vmatmul.mubr.msk.bf16.vlgmr.msra.gmra.mxu0 %vm533_vm3, %v1180_v24  ;;  %1081 = vmatmul.mubr.msk.bf16.vlgmr.msra.gmra.mxu1 %vm533_vm3, %v1180_v24 }
  0x27   : > { %1117 = vmatprep.mubr.msk.bf16.mxu0 %vm1240_vm4, %v1239_v25  ;;  %1123 = vmatprep.mubr.msk.bf16.mxu1 %vm1240_vm4, %v1239_v25 }
  0xde   : > { %v466_v28 = vpop.f32.mrf.mxu0  ;;  %v509_v29 = vpop.f32.mrf.mxu1 }
  0xe0   : > { %v468_v30 = vpop.f32.mrf.mxu0  ;;  %v511_v31 = vpop.f32.mrf.mxu1 }
  0xe2   : > { %v470_v32 = vpop.f32.mrf.mxu0  ;;  %v513_v33 = vpop.f32.mrf.mxu1 }
  0xe4   : > { %v472_v34 = vpop.f32.mrf.mxu0  ;;  %v515_v35 = vpop.f32.mrf.mxu1 }
  0xe6   : > { %v584_v36 = vpop.f32.mrf.mxu0  ;;  %v627_v37 = vpop.f32.mrf.mxu1 }
  0xe7   : > { %v585_v38 = vadd.f32 %v584_v36, %v466_v28  ;;  %v628_v43 = vadd.f32 %v627_v37, %v509_v29 }
  0xe8   : > { %v586_v39 = vpop.f32.mrf.mxu0  ;;  %v629_v40 = vpop.f32.mrf.mxu1 }
  0xe9   : > { %v587_v48 = vadd.f32 %v586_v39, %v468_v30  ;;  %v630_v55 = vadd.f32 %v629_v40, %v511_v31  ;;  %v643_v62 = vadd.f32 %v1082_v58, %v585_v38  ;;  %v829_v30 = vpop.permute.xlu1 %828  ;;  %v1184_v40 = vld [vmem:[%s1449_s7 + $0x8] sm:$0xff]  }
  0xea   : > { %v588_v41 = vpop.f32.mrf.mxu0  ;;  %v631_v42 = vpop.f32.mrf.mxu1 }
  0xeb   : > { %v589_v44 = vadd.f32 %v588_v41, %v470_v32  ;;  %v632_v45 = vadd.f32 %v631_v42, %v513_v33  ;;  %v1185_v41 = vld [vmem:[%s1449_s7] sm:$0xff]  }
  0xec   : > { %v590_v46 = vpop.f32.mrf.mxu0  ;;  %v633_v47 = vpop.f32.mrf.mxu1 }
  0xed   : > { %v700_v49 = vpack.c.bf16 %v632_v45, %v628_v43  ;;  %v591_v50 = vadd.f32 %v590_v46, %v472_v34  ;;  %v634_v53 = vadd.f32 %v633_v47, %v515_v35  ;;  %v644_v4 = vadd.f32 %v1082_v58, %v589_v44  ;;  %v831_v32 = vpop.permute.xlu1 %830 }
  0xef   : > { %v645_v52 = vpack.c.bf16 %v591_v50, %v587_v48  ;;  %1122 = vmatpush3.bf16.msra.mxu1 %v700_v49  ;;  %v755_v56 = vpack.c.bf16 %v634_v53, %v630_v55  ;;  %v1095_v53 = vld [vmem:[%s1450_s8] ss:$0 sm:$0xff] }
  0xf0   : > { %1133 = vmatprep.subr.bf16.mxu1 %v1239_v25 }
  0xf1   : > { %1116 = vmatpush3.bf16.msra.mxu0 %v645_v52 }
  0xf2   : > { %1127 = vmatprep.subr.bf16.mxu0 %v1239_v25  ;;  %1124 = vmatmul.mubr.msk.bf16.vlgmr.msra.gmra.mxu1 %vm653_vm5, %v1182_v51 }
  0xf3   : > { %1137 = vmatprep.mubr.msk.bf16.mxu1 %vm1240_vm4, %v1239_v25  ;;  %1134 = vmatpush3.bf16.msra.mxu1 %v1184_v40 }
  0xf4   : > { %1118 = vmatmul.mubr.msk.bf16.vlgmr.msra.gmra.mxu0 %vm653_vm5, %v1181_v54  ;;  %1135 = vmatprep.subr.bf16.mxu1 %v1239_v25 }
  0xf5   : > { %1128 = vmatpush3.bf16.msra.mxu0 %v755_v56  ;;  %1129 = vmatprep.mubr.msk.bf16.mxu0 %vm1240_vm4, %v1239_v25 }
  0xf7   : > { %1136 = vmatpush3.bf16.msra.mxu1 %v1185_v41 }
  0xfc   : > { %1130 = vmatmul.mubr.msk.bf16.vlgmr.msra.gmra.mxu0 %vm653_vm5, %v1183_v57 }
 0x1b2   : > { %v746_v59 = vpop.f32.mrf.mxu1 }
 0x1b4   : > { %v691_v60 = vpop.f32.mrf.mxu0  ;;  %v1125_v61 = vpop.f32.mrf.mxu1 }
 0x1b5   : > { %v698_v1 = vadd.f32 %v691_v60, %v643_v62 }
 0x1b6   : > { %v1119_v63 = vpop.f32.mrf.mxu0  ;;  %v749_v0 = vpop.f32.mrf.mxu1 }
 0x1b7   : > { %v753_v6 = vadd.f32 %v746_v59, %v698_v1 }
 0x1b8   : > { %v694_v2 = vpop.f32.mrf.mxu0  ;;  %v1126_v3 = vpop.f32.mrf.mxu1 }
 0x1b9   : > { %v699_v7 = vadd.f32 %v694_v2, %v644_v4 }
 0x1ba   : > { %v1120_v5 = vpop.f32.mrf.mxu0 }
 0x1bb   : > { %v754_v11 = vadd.f32 %v749_v0, %v699_v7 }
 0x1bc   : > { %v801_v8 = vpop.f32.mrf.mxu0 }
 0x1bd   : > { %v808_v9 = vadd.f32 %v801_v8, %v753_v6 }
 0x1be   : > { %v1131_v10 = vpop.f32.mrf.mxu0 }
 0x1bf   : > { %1186 = vtanh.f32 %v808_v9  ;;  %v1093_v17 = vmul.f32 -1.442695, %v808_v9 }
 0x1c0   : > { %v804_v12 = vpop.f32.mrf.mxu0 }
 0x1c1   : > { %v809_v13 = vadd.f32 %v804_v12, %v754_v11 }
 0x1c2   : > { %v1132_v14 = vpop.f32.mrf.mxu0 }
 0x1c3   : > { %1188 = vtanh.f32 %v809_v13  ;;  %v1094_v18 = vmul.f32 -1.442695, %v809_v13 }
 0x1c4   : > { %1190 = vpow2.f32 %v1093_v17 }
 0x1c5   : > { %1192 = vpow2.f32 %v1094_v18 }
 0x1cc   : > { %v1187_v15 = vpop.eup %1186 }
 0x1cd   : > { %838 = vrot.lane.b32.xlu0 %v1187_v15, %s1242_s28 }
 0x1d0   : > { %v1189_v16 = vpop.eup %1188 }
 0x1d1   : > { %840 = vrot.lane.b32.xlu0 %v1189_v16, %s1242_s28  ;;  %v1191_v19 = vpop.eup %1190 }
 0x1d2   : > { %v816_v20 = vadd.f32 1.0, %v1191_v19  ;;  %v1193_v21 = vpop.eup %1192 }
 0x1d3   : > { %v817_v22 = vadd.f32 1.0, %v1193_v21 }
 0x1d4   : > { %1194 = vrcp.f32 %v816_v20 }
 0x1d5   : > { %1196 = vrcp.f32 %v817_v22 }
 0x1e1   : > { %v1195_v23 = vpop.eup %1194 }
 0x1e2   : > { %v1197_v27 = vpop.eup %1196  ;;  %v834_v31 = vmul.f32 %v1195_v23, %v829_v30 }
 0x1e3   : > { %v835_v35 = vmul.f32 %v1197_v27, %v831_v32 }
 0x23f   : > { %v839_v24 = vpop.permute.xlu0 %838 }
 0x240   : > { %v844_v26 = vmul.f32 %v1195_v23, %v839_v24 }
 0x242   : > { %848 = vrot.lane.b32.xlu0 %v844_v26, %s1241_s18 }
 0x243   : > { %v841_v28 = vpop.permute.xlu0 %840 }
 0x244   : > { %v845_v29 = vmul.f32 %v1197_v27, %v841_v28 }
 0x246   : > { %850 = vrot.lane.b32.xlu1 %v845_v29, %s1241_s18 }
 0x2b4   : > { %v849_v33 = vpop.permute.xlu0 %848 }
 0x2b5   : > { %v854_v34 = vadd.f32 %v849_v33, %v834_v31 }
 0x2b7   : > { %1198 = vtanh.f32 %v854_v34 }
 0x2b8   : > { %v851_v36 = vpop.permute.xlu1 %850 }
 0x2b9   : > { %v855_v37 = vadd.f32 %v851_v36, %v835_v35 }
 0x2bb   : > { %1200 = vtanh.f32 %v855_v37 }
 0x2c4   : > { %v1199_v38 = vpop.eup %1198 }
 0x2c5   : > { %860 = vrot.lane.b32.xlu0 %v1199_v38, %s1242_s28 }
 0x2c8   : > { %v1201_v39 = vpop.eup %1200 }
 0x2c9   : > { %862 = vrot.lane.b32.xlu1 %v1201_v39, %s1242_s28 }
 0x337   : > { %v861_v42 = vpop.permute.xlu0 %860 }
 0x338   : > { %v866_v43 = vmul.f32 %v1195_v23, %v861_v42 }
 0x33a   : > { %870 = vrot.lane.b32.xlu1 %v866_v43, %s1241_s18  ;;  %v888_v46 = vmax.f32 %v866_v43, 0.0 }
 0x33b   : > { %v863_v44 = vpop.permute.xlu1 %862 }
 0x33c   : > { %v867_v45 = vmul.f32 %v1197_v27, %v863_v44 }
 0x33e   : > { %v889_v47 = vmax.f32 %v867_v45, 0.0  ;;  %880 = vrot.lane.b32.xlu1 %v854_v34, %s1243_s15 }
 0x340   : > { %v890_v48 = vpack.c.bf16 %v889_v47, %v888_v46 }
 0x342   : > { %903 = vrot.lane.b32.xlu0 %v890_v48, %s1241_s18 }
 0x346   : > { %872 = vrot.lane.b32.xlu0 %v867_v45, %s1241_s18 }
 0x34a   : > { %882 = vrot.lane.b32.xlu0 %v855_v37, %s1243_s15 }
 0x3ac   : > { %v871_v25 = vpop.permute.xlu1 %870 }
 0x3ad   : > { %876 = vst.msk [vmem:[#allocation2] sm:$0xff] %vm428_vm1, %v871_v25 }
 0x3b0   : > { %v881_v49 = vpop.permute.xlu1 %880 }
 0x3b1   : > { %886 = vst.msk [vmem:[#allocation3] sm:$0xff] %vm428_vm1, %v881_v49 }
 0x3b4   : > { %v904_v50 = vpop.permute.xlu0 %903 }
 0x3b5   : > { %1138 = vmatmul.mubr.msk.bf16.vlgmr.msra.gmra.mxu1 %vm428_vm1, %v904_v50 }
 0x3b8   : > { %v873_v51 = vpop.permute.xlu0 %872 }
 0x3b9   : > { %877 = vst.msk [vmem:[#allocation2 + $0x8] sm:$0xff] %vm428_vm1, %v873_v51 }
 0x3bc   : > { %v883_v52 = vpop.permute.xlu0 %882 }
 0x3bd   : > { %887 = vst.msk [vmem:[#allocation3 + $0x8] sm:$0xff] %vm428_vm1, %v883_v52 }
 0x475   : > { %v954_v54 = vpop.f32.mrf.mxu1 }
 0x476   : > { %v955_v55 = vadd.f32 %v1095_v53, %v954_v54 }
 0x477   : > { %v1139_v56 = vpop.f32.mrf.mxu1 }
 0x478   : > { %961 = vst [vmem:[%s1322_s23] sm:$0xff] %v955_v55  ;;  %966 = sbr.rel (%p1099_p5) target bundleno = 1151 (0x47f), region = 64 }
 0x479   : > { %v957_v57 = vpop.f32.mrf.mxu1 }
 0x47a   : > { %v958_v58 = vadd.f32 %v1095_v53, %v957_v57 }
 0x47b   : > { %v1140_v59 = vpop.f32.mrf.mxu1 }
 0x47c   : > { %962 = vst [vmem:[%s1322_s23 + $0x8] sm:$0xff] %v958_v58 }
 0x47d   : > { %967 = vst.msk [vmem:[#allocation4] sm:$0xff] %vm428_vm1, %v871_v25  ;;  %968 = vst.msk [vmem:[#allocation4 + $0x8] sm:$0xff] %vm428_vm1, %v873_v51 }
 0x47e   : > { %970 = vst.msk [vmem:[#allocation4 + $0x10] sm:$0xff] %vm428_vm1, %v881_v49  ;;  %971 = vst.msk [vmem:[#allocation4 + $0x18] sm:$0xff] %vm428_vm1, %v883_v52 }
 0x47f PF: > { %p1145_p6 = scmp.eq.s32.totalorder %s1308_s14, 7  ;;  %s1244_s18 = smov [#allocation4]  }
 0x480   : > { %s986_s20 = sshll.u32 %s1244_s18, 4  ;;  %s987_s20 = int_to_ptr.vmem [resolvable:$true] %s986_s20 }
 0x481   : > { %s1202_s19 = scalar_lea.vmem %s987_s20, 512  ;;  %p1209_p10 = scmp.lt.s32.totalorder %s987_s20, %s987_s20 }
 0x482   : > { %p1203_p7 = scmp.ne.s32.totalorder %s987_s20, %s1202_s19  ;;  %p1210_p11 = scmp.lt.s32.totalorder %s1202_s19, %s1202_s19 }
 0x484   : > { %p1204_p8 = pnand %p1203_p7, %p1145_p6  ;;  %p1211_p12 = por %p1210_p11, %p1209_p10 }
 0x486   : > { %p1205_p9 = pneg %p1204_p8 }
 0x488   : > { %p1212_p13 = pnand %p1211_p12, %p1205_p9 }
 0x48a   : > { %1215 = shalt.err (!%p1212_p13)
}
 0x48b   : > { %s1245_s23 = smov 128   ;;  %s1246_s21 = smov 8  }
 0x48c   : > { %1142 = dma.vmem_to_hbm [thread:$0]  (%p1145_p6), %s987_s20, 512, %s1452_s10, [#allocation5], %s1245_s23, %s1245_s23, %s1246_s21  }
 0x48d   : > { %1231 = dma.done.wait (%p1145_p6), [#allocation5], 512  }
 0x48e   : > { %1233 = vsyncadd (%p1145_p6), [#allocation5], 4294966784 }
 0x48f PF: > { %s22_s13 = sadd.s32 1, %s1236_s13  }
 0x490   : > { %p19_p0 = scmp.ge.s32.totalorder %s22_s13, 10  }
 0x492   :  { %21 = sbr.rel (!%p19_p0) target bundleno = 1 (0x1), region = 106 }
 0x497   :  { %1010 = vsyncpa [#allocation5], 1 }
 0x498   :  { %1012 = vsyncpa [#allocation5 + $0x1], 1 }

</bundles_post_ra>
